<compile_context>
chip_gen: v5e
topology: v5e:2x2
jax: 0.10.0
libtpu: 0.0.40
codegen_flags: <defaults>
</compile_context>

<pallas_src>
import functools

import jax
import jax.numpy as jnp
from jax.experimental import pallas as pl
from jax.experimental.pallas import tpu as pltpu

IN_DIM = 28 * 28
H1_DIM = 128
H2_DIM = 64
NUM_CLASSES = 10
TILE_M = 512           # batch rows per grid step (multiple of 8; sweep 256/512/1024)


def mlp_kernel(x_ref, w1_ref, b1_ref, w2_ref, b2_ref, w3_ref, b3_ref, o_ref):
    # fc1 + relu  (bf16 matmul on the MXU, f32 accumulate / elementwise)
    x = x_ref[...].astype(jnp.bfloat16)
    h1 = jnp.dot(x, w1_ref[...], preferred_element_type=jnp.float32)
    h1 = jnp.maximum(h1 + b1_ref[...], 0.0)

    # fc2 + relu
    h2 = jnp.dot(h1.astype(jnp.bfloat16), w2_ref[...],
                 preferred_element_type=jnp.float32)
    h2 = jnp.maximum(h2 + b2_ref[...], 0.0)

    # fc3 (narrow N=10 output; MXU underfill is free, kernel is HBM-bound)
    logits = jnp.dot(h2.astype(jnp.bfloat16), w3_ref[...],
                     preferred_element_type=jnp.float32)
    logits = logits + b3_ref[...]

    # log_softmax over the class axis (f32 on VPU/EUP/XLU)
    m = jnp.max(logits, axis=-1, keepdims=True)
    shifted = logits - m
    lse = jnp.log(jnp.sum(jnp.exp(shifted), axis=-1, keepdims=True))
    o_ref[...] = (shifted - lse).astype(o_ref.dtype)


@functools.partial(jax.jit, static_argnames=("tm",))
def simple_model_forward(x, params, tm=TILE_M):
    """x: [B, 784] (f32 or bf16).  Returns log-probs [B, 10] in f32."""
    w1, b1, w2, b2, w3, b3 = params
    B, D = x.shape

    # Don't spend a whole 512-row tile on a tiny batch; keep tm a multiple of 8.
    tm = min(tm, ((B + 7) // 8) * 8)
    num_tiles = pl.cdiv(B, tm)

    # bf16 weights for the MXU (halves resident-weight DMA); biases stay f32.
    w1b = w1.astype(jnp.bfloat16)
    w2b = w2.astype(jnp.bfloat16)
    w3b = w3.astype(jnp.bfloat16)

    nbytes = lambda a: a.size * a.dtype.itemsize
    cost = pl.CostEstimate(
        flops=2 * B * (IN_DIM * H1_DIM + H1_DIM * H2_DIM + H2_DIM * NUM_CLASSES),
        transcendentals=B * (NUM_CLASSES + 1),
        bytes_accessed=(nbytes(x) + nbytes(w1b) + nbytes(w2b) + nbytes(w3b)
                        + nbytes(b1) + nbytes(b2) + nbytes(b3)
                        + B * NUM_CLASSES * 4),
    )

    const2d = lambda i: (0, 0)
    out = pl.pallas_call(
        mlp_kernel,
        out_shape=jax.ShapeDtypeStruct((B, NUM_CLASSES), jnp.float32),
        grid=(num_tiles,),
        in_specs=[
            pl.BlockSpec((tm, D), lambda i: (i, 0)),            # x: streamed per tile
            pl.BlockSpec((IN_DIM, H1_DIM), const2d),            # w1: resident
            pl.BlockSpec((1, H1_DIM), const2d),                 # b1
            pl.BlockSpec((H1_DIM, H2_DIM), const2d),            # w2
            pl.BlockSpec((1, H2_DIM), const2d),                 # b2
            pl.BlockSpec((H2_DIM, NUM_CLASSES), const2d),       # w3
            pl.BlockSpec((1, NUM_CLASSES), const2d),            # b3
        ],
        # Narrow output block (10 == full dim -> legal); OOB rows of the last
        # partial tile are masked on store, so no wrapper pad/slice is needed.
        out_specs=pl.BlockSpec((tm, NUM_CLASSES), lambda i: (i, 0)),
        compiler_params=pltpu.CompilerParams(
            dimension_semantics=("parallel",),
        ),
        cost_estimate=cost,
    )(x, w1b, b1, w2b, b2, w3b, b3)
    return out


def init_params(key):
    # Deterministic init mimicking PyTorch Linear default:
    # U(-1/sqrt(fan_in), 1/sqrt(fan_in)); weights stored [in, out] so the
    # kernel computes x @ W + b (== PyTorch's x @ W.T + b).
    k1, k2, k3, k4, k5, k6 = jax.random.split(key, 6)

    def uniform(k, shape, fan_in):
        bound = 1.0 / jnp.sqrt(float(fan_in))
        return jax.random.uniform(k, shape, jnp.float32, -bound, bound)

    w1 = uniform(k1, (IN_DIM, H1_DIM), IN_DIM)
    b1 = uniform(k2, (1, H1_DIM), IN_DIM)
    w2 = uniform(k3, (H1_DIM, H2_DIM), H1_DIM)
    b2 = uniform(k4, (1, H2_DIM), H1_DIM)
    w3 = uniform(k5, (H2_DIM, NUM_CLASSES), H2_DIM)
    b3 = uniform(k6, (1, NUM_CLASSES), H2_DIM)
    return (w1, b1, w2, b2, w3, b3)


def reference_forward(x, params):
    # Pure f32 reference (kernel uses bf16 MXU inputs -> compare with a
    # tolerance appropriate for bf16 matmuls).
    w1, b1, w2, b2, w3, b3 = params
    h1 = jnp.maximum(x @ w1 + b1, 0.0)
    h2 = jnp.maximum(h1 @ w2 + b2, 0.0)
    logits = h2 @ w3 + b3
    return jax.nn.log_softmax(logits, axis=1)


if __name__ == "__main__":
    key = jax.random.PRNGKey(0)
    kx, kp = jax.random.split(key)
    B = 8
    x = jax.random.normal(kx, (B, IN_DIM), jnp.float32)
    params = init_params(kp)

    out = simple_model_forward(x, params)
    out = jax.block_until_ready(out)

    ref = reference_forward(x, params)
    assert out.shape == (B, NUM_CLASSES)
    assert bool(jnp.all(jnp.isfinite(out)))
    # bf16-matmul kernel vs f32 reference: loose tolerance, plus argmax check
    assert jnp.allclose(out, ref, atol=5e-2, rtol=5e-2), "mismatch vs reference"
    assert bool(jnp.all(jnp.argmax(out, axis=1) == jnp.argmax(ref, axis=1)))
    print("KERNEL_OK")
</pallas_src>

<mosaic_0001>
module attributes {stable_mosaic.version = 11 : i64} {
  func.func @mlp_kernel(%arg0: i32, %arg1: memref<8x784xf32, #tpu.memory_space<vmem>>, %arg2: memref<784x128xbf16, #tpu.memory_space<vmem>>, %arg3: memref<1x128xf32, #tpu.memory_space<vmem>>, %arg4: memref<128x64xbf16, #tpu.memory_space<vmem>>, %arg5: memref<1x64xf32, #tpu.memory_space<vmem>>, %arg6: memref<64x10xbf16, #tpu.memory_space<vmem>>, %arg7: memref<1x10xf32, #tpu.memory_space<vmem>>, %arg8: memref<8x10xf32, #tpu.memory_space<vmem>>) attributes {dimension_semantics = [#tpu.dimension_semantics<parallel>], iteration_bounds = array<i64: 1>, scalar_prefetch = 0 : i64, scratch_operands = 0 : i64, tpu.core_type = #tpu.core_type<tc>, window_params = [{transform_indices = @transform_0, window_bounds = array<i64: 8, 784>}, {pipeline_mode = #tpu.pipeline_mode<synchronous>, transform_indices = @transform_1, window_bounds = array<i64: 784, 128>}, {pipeline_mode = #tpu.pipeline_mode<synchronous>, transform_indices = @transform_2, window_bounds = array<i64: 1, 128>}, {pipeline_mode = #tpu.pipeline_mode<synchronous>, transform_indices = @transform_3, window_bounds = array<i64: 128, 64>}, {pipeline_mode = #tpu.pipeline_mode<synchronous>, transform_indices = @transform_4, window_bounds = array<i64: 1, 64>}, {pipeline_mode = #tpu.pipeline_mode<synchronous>, transform_indices = @transform_5, window_bounds = array<i64: 64, 10>}, {pipeline_mode = #tpu.pipeline_mode<synchronous>, transform_indices = @transform_6, window_bounds = array<i64: 1, 10>}, {transform_indices = @transform_7, window_bounds = array<i64: 8, 10>}]} {
    %c0 = arith.constant 0 : index
    %c0_0 = arith.constant 0 : index
    %0 = vector.load %arg1[%c0, %c0_0] : memref<8x784xf32, #tpu.memory_space<vmem>>, vector<8x784xf32>
    %1 = arith.truncf %0 : vector<8x784xf32> to vector<8x784xbf16>
    %c0_1 = arith.constant 0 : index
    %c0_2 = arith.constant 0 : index
    %2 = vector.load %arg2[%c0_1, %c0_2] : memref<784x128xbf16, #tpu.memory_space<vmem>>, vector<784x128xbf16>
    %cst = arith.constant dense<0.000000e+00> : vector<8x128xf32>
    %3 = tpu.matmul %1, %2, %cst {dimension_numbers = #tpu.dot_dimension_numbers<[1], [0], [0], [1], [0, 0, 1, 1], [], []>} : vector<8x784xbf16>, vector<784x128xbf16>, vector<8x128xf32> -> vector<8x128xf32>
    %c0_3 = arith.constant 0 : index
    %c0_4 = arith.constant 0 : index
    %4 = vector.load %arg3[%c0_3, %c0_4] : memref<1x128xf32, #tpu.memory_space<vmem>>, vector<1x128xf32>
    %5 = vector.broadcast %4 : vector<1x128xf32> to vector<8x128xf32>
    %6 = arith.addf %3, %5 : vector<8x128xf32>
    %cst_5 = arith.constant 0.000000e+00 : f32
    %7 = vector.broadcast %cst_5 : f32 to vector<8x128xf32>
    %8 = arith.maximumf %6, %7 : vector<8x128xf32>
    %9 = arith.truncf %8 : vector<8x128xf32> to vector<8x128xbf16>
    %c0_6 = arith.constant 0 : index
    %c0_7 = arith.constant 0 : index
    %10 = vector.load %arg4[%c0_6, %c0_7] : memref<128x64xbf16, #tpu.memory_space<vmem>>, vector<128x64xbf16>
    %cst_8 = arith.constant dense<0.000000e+00> : vector<8x64xf32>
    %11 = tpu.matmul %9, %10, %cst_8 {dimension_numbers = #tpu.dot_dimension_numbers<[1], [0], [0], [1], [0, 0, 1, 1], [], []>} : vector<8x128xbf16>, vector<128x64xbf16>, vector<8x64xf32> -> vector<8x64xf32>
    %c0_9 = arith.constant 0 : index
    %c0_10 = arith.constant 0 : index
    %12 = vector.load %arg5[%c0_9, %c0_10] : memref<1x64xf32, #tpu.memory_space<vmem>>, vector<1x64xf32>
    %13 = vector.broadcast %12 : vector<1x64xf32> to vector<8x64xf32>
    %14 = arith.addf %11, %13 : vector<8x64xf32>
    %cst_11 = arith.constant 0.000000e+00 : f32
    %15 = vector.broadcast %cst_11 : f32 to vector<8x64xf32>
    %16 = arith.maximumf %14, %15 : vector<8x64xf32>
    %17 = arith.truncf %16 : vector<8x64xf32> to vector<8x64xbf16>
    %c0_12 = arith.constant 0 : index
    %c0_13 = arith.constant 0 : index
    %18 = vector.load %arg6[%c0_12, %c0_13] : memref<64x10xbf16, #tpu.memory_space<vmem>>, vector<64x10xbf16>
    %cst_14 = arith.constant dense<0.000000e+00> : vector<8x10xf32>
    %19 = tpu.matmul %17, %18, %cst_14 {dimension_numbers = #tpu.dot_dimension_numbers<[1], [0], [0], [1], [0, 0, 1, 1], [], []>} : vector<8x64xbf16>, vector<64x10xbf16>, vector<8x10xf32> -> vector<8x10xf32>
    %c0_15 = arith.constant 0 : index
    %c0_16 = arith.constant 0 : index
    %20 = vector.load %arg7[%c0_15, %c0_16] : memref<1x10xf32, #tpu.memory_space<vmem>>, vector<1x10xf32>
    %21 = vector.broadcast %20 : vector<1x10xf32> to vector<8x10xf32>
    %22 = arith.addf %19, %21 : vector<8x10xf32>
    %cst_17 = arith.constant dense<0xFF800000> : vector<8xf32>
    %23 = vector.multi_reduction <maximumf>, %22, %cst_17 [1] : vector<8x10xf32> to vector<8xf32>
    %24 = vector.shape_cast %23 : vector<8xf32> to vector<8x1xf32>
    %25 = vector.broadcast %24 : vector<8x1xf32> to vector<8x10xf32>
    %26 = arith.subf %22, %25 : vector<8x10xf32>
    %27 = math.exp %26 : vector<8x10xf32>
    %cst_18 = arith.constant dense<0.000000e+00> : vector<8xf32>
    %28 = vector.multi_reduction <add>, %27, %cst_18 [1] : vector<8x10xf32> to vector<8xf32>
    %29 = vector.shape_cast %28 : vector<8xf32> to vector<8x1xf32>
    %30 = math.log %29 : vector<8x1xf32>
    %31 = vector.broadcast %30 : vector<8x1xf32> to vector<8x10xf32>
    %32 = arith.subf %26, %31 : vector<8x10xf32>
    %c0_19 = arith.constant 0 : index
    %c0_20 = arith.constant 0 : index
    %33 = vector.load %arg8[%c0_19, %c0_20] : memref<8x10xf32, #tpu.memory_space<vmem>>, vector<8x10xf32>
    tpu.vector_store %arg8[%c0_19, %c0_20], %32 {strides = array<i32>} : memref<8x10xf32, #tpu.memory_space<vmem>>, vector<8x10xf32>,
    return
  }
  func.func @transform_0(%arg0: i32) -> (i32, i32) {
    %c0_i32 = arith.constant 0 : i32
    %c0_i32_0 = arith.constant 0 : i32
    return %arg0, %c0_i32 : i32, i32
  }
  func.func @transform_1(%arg0: i32) -> (i32, i32) {
    %c0_i32 = arith.constant 0 : i32
    %c0_i32_0 = arith.constant 0 : i32
    %c0_i32_1 = arith.constant 0 : i32
    return %c0_i32, %c0_i32_0 : i32, i32
  }
  func.func @transform_2(%arg0: i32) -> (i32, i32) {
    %c0_i32 = arith.constant 0 : i32
    %c0_i32_0 = arith.constant 0 : i32
    %c0_i32_1 = arith.constant 0 : i32
    return %c0_i32, %c0_i32_0 : i32, i32
  }
  func.func @transform_3(%arg0: i32) -> (i32, i32) {
    %c0_i32 = arith.constant 0 : i32
    %c0_i32_0 = arith.constant 0 : i32
    %c0_i32_1 = arith.constant 0 : i32
    return %c0_i32, %c0_i32_0 : i32, i32
  }
  func.func @transform_4(%arg0: i32) -> (i32, i32) {
    %c0_i32 = arith.constant 0 : i32
    %c0_i32_0 = arith.constant 0 : i32
    %c0_i32_1 = arith.constant 0 : i32
    return %c0_i32, %c0_i32_0 : i32, i32
  }
  func.func @transform_5(%arg0: i32) -> (i32, i32) {
    %c0_i32 = arith.constant 0 : i32
    %c0_i32_0 = arith.constant 0 : i32
    %c0_i32_1 = arith.constant 0 : i32
    return %c0_i32, %c0_i32_0 : i32, i32
  }
  func.func @transform_6(%arg0: i32) -> (i32, i32) {
    %c0_i32 = arith.constant 0 : i32
    %c0_i32_0 = arith.constant 0 : i32
    %c0_i32_1 = arith.constant 0 : i32
    return %c0_i32, %c0_i32_0 : i32, i32
  }
  func.func @transform_7(%arg0: i32) -> (i32, i32) {
    %c0_i32 = arith.constant 0 : i32
    %c0_i32_0 = arith.constant 0 : i32
    return %arg0, %c0_i32 : i32, i32
  }
}

</mosaic_0001>

<bundles_post_ra>
// kernel: simple_model_forward.1
= control target key start
LH: loop header
LB: loop body
LE: loop exit
PB: predicated region body
PF: predicated region fallthrough
CT: control target
= control target key end

     0   :  { %s1302_s0 = inlined_call_operand.vmem [shape: f32[8,784], index: 0, kind: input, shape index: {}]   ;;  %s1303_s1 = inlined_call_operand.vmem [shape: bf16[784,128], index: 1, kind: input, shape index: {}]   ;;  %s1304_s2 = inlined_call_operand.vmem [shape: f32[1,128], index: 2, kind: input, shape index: {}]   ;;  %s1305_s3 = inlined_call_operand.vmem [shape: bf16[128,64], index: 3, kind: input, shape index: {}]   ;;  %s1306_s4 = inlined_call_operand.vmem [shape: f32[1,64], index: 4, kind: input, shape index: {}]   ;;  %s1307_s5 = inlined_call_operand.vmem [shape: bf16[64,10], index: 5, kind: input, shape index: {}]   ;;  %s1308_s6 = inlined_call_operand.vmem [shape: f32[1,10], index: 6, kind: input, shape index: {}]   ;;  %s1309_s7 = inlined_call_operand.hbm [shape: f32[8,10], index: 7, kind: output, shape index: {}]  }
   0x1   :  { %v954_v0 = vld [vmem:[%s1303_s1 + $0x38] sm:$0xff]  ;;  %v953_v3 = vld [vmem:[%s1303_s1 + $0x30] sm:$0xff]  ;;  %v952_v8 = vld [vmem:[%s1303_s1 + $0x28] sm:$0xff] }
   0x2   :  { %v962_v1 = vld [vmem:[%s1303_s1 + $0x78] sm:$0xff]  ;;  %442 = vmatpush.bf16.msra.mxu0 %v954_v0  ;;  %v961_v4 = vld [vmem:[%s1303_s1 + $0x70] sm:$0xff]  ;;  %v960_v9 = vld [vmem:[%s1303_s1 + $0x68] sm:$0xff] }
   0x3   :  { %v970_v2 = vld [vmem:[%s1303_s1 + $0xb8] sm:$0xff]  ;;  %455 = vmatpush.bf16.msra.mxu1 %v962_v1  ;;  %v969_v5 = vld [vmem:[%s1303_s1 + $0xb0] sm:$0xff]  ;;  %v968_v10 = vld [vmem:[%s1303_s1 + $0xa8] sm:$0xff] }
   0x4   :  { %468 = vmatpush.bf16.msra.mxu2 %v970_v2  ;;  %v978_v6 = vld [vmem:[%s1303_s1 + $0xf8] sm:$0xff]  ;;  %v977_v7 = vld [vmem:[%s1303_s1 + $0xf0] sm:$0xff]  ;;  %v976_v11 = vld [vmem:[%s1303_s1 + $0xe8] sm:$0xff] }
   0x5   :  { %481 = vmatpush.bf16.msra.mxu3 %v978_v6  ;;  %v951_v12 = vld [vmem:[%s1303_s1 + $0x20] sm:$0xff]  ;;  %v950_v16 = vld [vmem:[%s1303_s1 + $0x18] sm:$0xff] }
   0x6   :  { %443 = vmatpush.bf16.msra.mxu0 %v953_v3  ;;  %v959_v13 = vld [vmem:[%s1303_s1 + $0x60] sm:$0xff]  ;;  %v958_v17 = vld [vmem:[%s1303_s1 + $0x58] sm:$0xff] }
   0x7   :  { %456 = vmatpush.bf16.msra.mxu1 %v961_v4  ;;  %v967_v14 = vld [vmem:[%s1303_s1 + $0xa0] sm:$0xff]  ;;  %v966_v18 = vld [vmem:[%s1303_s1 + $0x98] sm:$0xff] }
   0x8   :  { %469 = vmatpush.bf16.msra.mxu2 %v969_v5  ;;  %v975_v15 = vld [vmem:[%s1303_s1 + $0xe0] sm:$0xff]  ;;  %v974_v19 = vld [vmem:[%s1303_s1 + $0xd8] sm:$0xff] }
   0x9   :  { %482 = vmatpush.bf16.msra.mxu3 %v977_v7 }
   0xa   :  { %444 = vmatpush.bf16.msra.mxu0 %v952_v8 }
   0xb   :  { %457 = vmatpush.bf16.msra.mxu1 %v960_v9 }
   0xc   :  { %470 = vmatpush.bf16.msra.mxu2 %v968_v10 }
   0xd   :  { %483 = vmatpush.bf16.msra.mxu3 %v976_v11 }
   0xe   :  { %445 = vmatpush.bf16.msra.mxu0 %v951_v12 }
   0xf   :  { %458 = vmatpush.bf16.msra.mxu1 %v959_v13 }
  0x10   :  { %471 = vmatpush.bf16.msra.mxu2 %v967_v14 }
  0x11   :  { %484 = vmatpush.bf16.msra.mxu3 %v975_v15 }
  0x12   :  { %12 = vsyncpa [#allocation3], 0  ;;  %446 = vmatpush.bf16.msra.mxu0 %v950_v16  ;;  %v949_v20 = vld [vmem:[%s1303_s1 + $0x10] sm:$0xff]  ;;  %v948_v24 = vld [vmem:[%s1303_s1 + $0x8] sm:$0xff]  ;;  %vm438_vm0 = vcmask 130048   ;;  %vm654_vm1 = vcmask 523264  }
  0x13   :  { %459 = vmatpush.bf16.msra.mxu1 %v958_v17  ;;  %v957_v21 = vld [vmem:[%s1303_s1 + $0x50] sm:$0xff]  ;;  %v956_v25 = vld [vmem:[%s1303_s1 + $0x48] sm:$0xff]  ;;  %v947_v27 = vld [vmem:[%s1303_s1] sm:$0xff]  ;;  %vm671_vm2 = vcmask 80896   ;;  %s692_s24 = sshll.u32 %s1309_s7, 4  ;;  %s693_s24 = int_to_ptr.hbm [resolvable:$true] %s692_s24 }
  0x14   :  { %472 = vmatpush.bf16.msra.mxu2 %v966_v18  ;;  %v965_v22 = vld [vmem:[%s1303_s1 + $0x90] sm:$0xff]  ;;  %v964_v26 = vld [vmem:[%s1303_s1 + $0x88] sm:$0xff]  ;;  %v955_v29 = vld [vmem:[%s1303_s1 + $0x40] sm:$0xff] }
  0x15   :  { %485 = vmatpush.bf16.msra.mxu3 %v974_v19  ;;  %v973_v23 = vld [vmem:[%s1303_s1 + $0xd0] sm:$0xff]  ;;  %v972_v28 = vld [vmem:[%s1303_s1 + $0xc8] sm:$0xff]  ;;  %v28_v30 = vld [vmem:[%s1302_s0] sm:$0xff] }
  0x16   :  { %447 = vmatpush.bf16.msra.mxu0 %v949_v20  ;;  %v29_v31 = vld [vmem:[%s1302_s0 + $0x8] sm:$0xff]  ;;  %v986_v32 = vld [vmem:[%s1303_s1 + $0x138] sm:$0xff]  ;;  %v963_v34 = vld [vmem:[%s1303_s1 + $0x80] sm:$0xff]  ;;  %v35_v36 = vpack.c.bf16 %v28_v30, %v28_v30 }
  0x17   :  { %460 = vmatpush.bf16.msra.mxu1 %v957_v21  ;;  %v994_v33 = vld [vmem:[%s1303_s1 + $0x178] sm:$0xff]  ;;  %v30_v35 = vld [vmem:[%s1302_s0 + $0x10] sm:$0xff]  ;;  %v36_v37 = vpack.c.bf16 %v29_v31, %v29_v31  ;;  %v971_v38 = vld [vmem:[%s1303_s1 + $0xc0] sm:$0xff] }
  0x18   :  { %473 = vmatpush.bf16.msra.mxu2 %v965_v22  ;;  %v995_v39 = vld [vmem:[%s1303_s1 + $0x180] sm:$0xff]  ;;  %v31_v40 = vld [vmem:[%s1302_s0 + $0x18] sm:$0xff]  ;;  %v985_v41 = vld [vmem:[%s1303_s1 + $0x130] sm:$0xff]  ;;  %v37_v43 = vpack.c.bf16 %v30_v35, %v30_v35 }
  0x19   :  { %486 = vmatpush.bf16.msra.mxu3 %v973_v23  ;;  %v993_v42 = vld [vmem:[%s1303_s1 + $0x170] sm:$0xff]  ;;  %v38_v44 = vpack.c.bf16 %v31_v40, %v31_v40  ;;  %v984_v45 = vld [vmem:[%s1303_s1 + $0x128] sm:$0xff]  ;;  %v983_v47 = vld [vmem:[%s1303_s1 + $0x120] sm:$0xff] }
  0x1a   :  { %448 = vmatpush.bf16.msra.mxu0 %v948_v24  ;;  %v992_v46 = vld [vmem:[%s1303_s1 + $0x168] sm:$0xff]  ;;  %v991_v48 = vld [vmem:[%s1303_s1 + $0x160] sm:$0xff]  ;;  %v982_v49 = vld [vmem:[%s1303_s1 + $0x118] sm:$0xff] }
  0x1b   :  { %461 = vmatpush.bf16.msra.mxu1 %v956_v25  ;;  %v990_v50 = vld [vmem:[%s1303_s1 + $0x158] sm:$0xff]  ;;  %v34_v51 = vld [vmem:[%s1302_s0 + $0x30] sm:$0xff]  ;;  %v980_v55 = vld [vmem:[%s1303_s1 + $0x108] sm:$0xff] }
  0x1c   :  { %474 = vmatpush.bf16.msra.mxu2 %v964_v26  ;;  %v981_v52 = vld [vmem:[%s1303_s1 + $0x110] sm:$0xff]  ;;  %v41_v54 = vpack.c.bf16 %v34_v51, %v34_v51  ;;  %v988_v56 = vld [vmem:[%s1303_s1 + $0x148] sm:$0xff]  ;;  %v979_v57 = vld [vmem:[%s1303_s1 + $0x100] sm:$0xff] }
  0x1d   :  { %487 = vmatpush.bf16.msra.mxu3 %v972_v28  ;;  %v989_v53 = vld [vmem:[%s1303_s1 + $0x150] sm:$0xff]  ;;  %v987_v58 = vld [vmem:[%s1303_s1 + $0x140] sm:$0xff]  ;;  %v33_v60 = vld [vmem:[%s1302_s0 + $0x28] sm:$0xff] }
  0x1e   :  { %449 = vmatpush.bf16.msra.mxu0 %v947_v27  ;;  %v32_v59 = vld [vmem:[%s1302_s0 + $0x20] sm:$0xff]  ;;  %v40_v62 = vpack.c.bf16 %v33_v60, %v33_v60  ;;  %v1003_v63 = vld [vmem:[%s1305_s3 + $0x38] sm:$0xff]  ;;  %v1002_v0 = vld [vmem:[%s1305_s3 + $0x30] sm:$0xff] }
  0x1f   :  { %462 = vmatpush.bf16.msra.mxu1 %v955_v29  ;;  %v39_v61 = vpack.c.bf16 %v32_v59, %v32_v59  ;;  %v1001_v1 = vld [vmem:[%s1305_s3 + $0x28] sm:$0xff]  ;;  %v1000_v2 = vld [vmem:[%s1305_s3 + $0x20] sm:$0xff]  ;;  %v999_v3 = vld [vmem:[%s1305_s3 + $0x18] sm:$0xff] }
  0x20   :  { %475 = vmatpush.bf16.msra.mxu2 %v963_v34  ;;  %v998_v4 = vld [vmem:[%s1305_s3 + $0x10] sm:$0xff]  ;;  %v997_v5 = vld [vmem:[%s1305_s3 + $0x8] sm:$0xff]  ;;  %v996_v8 = vld [vmem:[%s1305_s3] sm:$0xff] }
  0x21   :  { %450 = vmatmul.bf16.vlgmr.msra.gmra.mxu0 %v35_v36  ;;  %488 = vmatpush.bf16.msra.mxu3 %v971_v38  ;;  %v1007_v11 = vld [vmem:[%s1307_s5 + $0x18] sm:$0xff]  ;;  %v1006_v14 = vld [vmem:[%s1307_s5 + $0x10] sm:$0xff]  ;;  %v1009_v15 = vld [vmem:[%s1304_s2] ss:$0 sm:$0xff] }
  0x22   :  { %494 = vmatpush.bf16.msrb.mxu0 %v986_v32  ;;  %463 = vmatmul.bf16.vlgmr.msra.gmra.mxu1 %v36_v37  ;;  %v1005_v16 = vld [vmem:[%s1307_s5 + $0x8] sm:$0xff]  ;;  %v1004_v34 = vld [vmem:[%s1307_s5] sm:$0xff] }
  0x23   :  { %507 = vmatpush.bf16.msrb.mxu1 %v994_v33  ;;  %476 = vmatmul.bf16.vlgmr.msra.gmra.mxu2 %v37_v43  ;;  %v1010_v35 = vld [vmem:[%s1306_s4] ss:$0 sm:$0xff]  ;;  %s1042_s4 = smov [#allocation2]  }
  0x24   :  { %527 = vmatpush.bf16.msrb.mxu2 %v995_v39  ;;  %489 = vmatmul.bf16.vlgmr.msra.gmra.mxu3 %v38_v44  ;;  %s690_s5 = sshll.u32 %s1042_s4, 4  ;;  %s691_s5 = int_to_ptr.vmem [resolvable:$true] %s690_s5 }
  0x25   :  { %603 = vmatpush.bf16.msrb.mxu3 %v1003_v63 }
  0x26   :  { %495 = vmatpush.bf16.msrb.mxu0 %v985_v41  ;;  %v1011_v41 = vld [vmem:[%s1308_s6] ss:$0 sm:$0xff] }
  0x27   :  { %508 = vmatpush.bf16.msrb.mxu1 %v993_v42 }
  0x28   :  { %662 = vmatpush.bf16.msra.mxu2 %v1007_v11 }
  0x29   :  { %604 = vmatpush.bf16.msrb.mxu3 %v1002_v0 }
  0x2a   :  { %496 = vmatpush.bf16.msrb.mxu0 %v984_v45 }
  0x2b   :  { %509 = vmatpush.bf16.msrb.mxu1 %v992_v46 }
  0x2c   :  { %663 = vmatpush.bf16.msra.mxu2 %v1006_v14 }
  0x2d   :  { %605 = vmatpush.bf16.msrb.mxu3 %v1001_v1 }
  0x2e   :  { %497 = vmatpush.bf16.msrb.mxu0 %v983_v47 }
  0x2f   :  { %510 = vmatpush.bf16.msrb.mxu1 %v991_v48 }
  0x30   :  { %664 = vmatpush.bf16.msra.mxu2 %v1005_v16 }
  0x31   :  { %606 = vmatpush.bf16.msrb.mxu3 %v1000_v2 }
  0x32   :  { %498 = vmatpush.bf16.msrb.mxu0 %v982_v49 }
  0x33   :  { %511 = vmatpush.bf16.msrb.mxu1 %v990_v50  ;;  %897 = vmatmul.msk.bf16.vlgmr.msrb.gmra.mxu2 %vm438_vm0, %v41_v54 }
  0x34   :  { %665 = vmatpush.bf16.msra.mxu2 %v1004_v34 }
  0x35   :  { %607 = vmatpush.bf16.msrb.mxu3 %v999_v3 }
  0x36   :  { %499 = vmatpush.bf16.msrb.mxu0 %v981_v52 }
  0x37   :  { %512 = vmatpush.bf16.msrb.mxu1 %v989_v53 }
  0x39   :  { %608 = vmatpush.bf16.msrb.mxu3 %v998_v4 }
  0x3a   :  { %500 = vmatpush.bf16.msrb.mxu0 %v980_v55 }
  0x3b   :  { %513 = vmatpush.bf16.msrb.mxu1 %v988_v56 }
  0x3d   :  { %609 = vmatpush.bf16.msrb.mxu3 %v997_v5 }
  0x3e   :  { %501 = vmatpush.bf16.msrb.mxu0 %v979_v57 }
  0x3f   :  { %514 = vmatpush.bf16.msrb.mxu1 %v987_v58 }
  0x41   :  { %502 = vmatmul.bf16.vlgmr.msrb.gmra.mxu0 %v39_v61  ;;  %610 = vmatpush.bf16.msrb.mxu3 %v996_v8 }
  0x42   :  { %515 = vmatmul.bf16.vlgmr.msrb.gmra.mxu1 %v40_v62 }
  0x9e   :  { %v451_v6 = vpop.f32.mrf.mxu0 }
  0x9f   :  { %v464_v7 = vpop.f32.mrf.mxu1  ;;  %v452_v17 = vadd.f32 %v1009_v15, %v451_v6 }
  0xa1   :  { %v465_v20 = vadd.f32 %v464_v7, %v452_v17 }
  0xa6   :  { %v453_v9 = vpop.f32.mrf.mxu0  ;;  %v477_v12 = vpop.f32.mrf.mxu2 }
  0xa7   :  { %v466_v10 = vpop.f32.mrf.mxu1  ;;  %v490_v13 = vpop.f32.mrf.mxu3  ;;  %v478_v21 = vadd.f32 %v477_v12, %v465_v20 }
  0xa9   :  { %v491_v23 = vadd.f32 %v490_v13, %v478_v21 }
  0xae   :  { %v479_v18 = vpop.f32.mrf.mxu2 }
  0xaf   :  { %v492_v19 = vpop.f32.mrf.mxu3 }
  0xb6   :  { %v529_v22 = vpop.f32.mrf.mxu2 }
  0xbe   :  { %v503_v24 = vpop.f32.mrf.mxu0  ;;  %v531_v28 = vpop.f32.mrf.mxu2 }
  0xbf   :  { %v516_v25 = vpop.f32.mrf.mxu1  ;;  %v504_v26 = vadd.f32 %v503_v24, %v491_v23 }
  0xc1   :  { %v517_v27 = vadd.f32 %v516_v25, %v504_v26 }
  0xc3   :  { %v530_v29 = vadd.f32 %v529_v22, %v517_v27 }
  0xc5   :  { %v533_v30 = vmax.f32 %v530_v29, 0.0 }
  0xc6   :  { %v505_v31 = vpop.f32.mrf.mxu0 }
  0xc7   :  { %v518_v32 = vpop.f32.mrf.mxu1  ;;  %v534_v33 = vpack.c.bf16 %v533_v30, %v533_v30 }
  0xc9   :  { %611 = vmatmul.bf16.vlgmr.msrb.gmra.mxu3 %v534_v33 }
 0x14c   :  { %v612_v36 = vpop.f32.mrf.mxu3 }
 0x14d   :  { %v613_v37 = vadd.f32 %v1010_v35, %v612_v36 }
 0x14f   :  { %v616_v38 = vmax.f32 %v613_v37, 0.0 }
 0x151   :  { %v617_v39 = vpack.c.bf16 %v616_v38, %v616_v38 }
 0x153   :  { %946 = vmatmul.msk.bf16.vlgmr.msra.gmra.mxu2 %vm654_vm1, %v617_v39 }
 0x154   :  { %v614_v40 = vpop.f32.mrf.mxu3 }
 0x1d6   :  { %v667_v42 = vpop.f32.mrf.mxu2 }
 0x1d7   :  { %v668_v43 = vadd.f32 %v1011_v41, %v667_v42 }
 0x1d9   :  { %v672_v44 = vsel %vm671_vm2, %v668_v43, -inf }
 0x1da   :  { %673 = vmax.xlane.f32.xlu0 %v672_v44 }
 0x1de   :  { %v669_v45 = vpop.f32.mrf.mxu2 }
 0x24d   :  { %v674_v46 = vpop.xlane.xlu0 %673 }
 0x24e   :  { %v675_v47 = vsub.f32 %v668_v43, %v674_v46 }
 0x250   :  { %v676_v48 = vmul.f32 1.442695, %v675_v47 }
 0x252   :  { %1012 = vpow2.f32 %v676_v48 }
 0x258   :  { %v1013_v49 = vpop.eup %1012 }
 0x259   :  { %v678_v50 = vsel %vm671_vm2, %v1013_v49, 0.0 }
 0x25a   :  { %679 = vadd.xlane.f32.xlu0 %v678_v50 }
 0x2cd   :  { %v680_v51 = vpop.xlane.xlu0 %679 }
 0x2ce   :  { %1014 = vlog2.f32 %v680_v51 }
 0x2d4   :  { %v1015_v52 = vpop.eup %1014 }
 0x2d5   :  { %v682_v53 = vmul.f32 0.6931472, %v1015_v52 }
 0x2d7   :  { %v683_v54 = vsub.f32 %v675_v47, %v682_v53 }
 0x2d9   :  { %684 = vst.msk [vmem:[#allocation2] sm:$0xff] %vm671_vm2, %v683_v54 }
 0x2da   :  { %695 = dma.vmem_to_hbm [thread:$0]  %s691_s5, 128, %s693_s24, [#allocation3]  }
 0x2db   :  { %1040 = dma.done.wait [#allocation3], 128  }
 0x2dc   :  { %1041 = vsyncadd [#allocation3], 4294967168 }
 0x2dd   :  { %700 = vsyncpa [#allocation3], 1 }

</bundles_post_ra>
